<compile_context>
chip_gen: v6e
topology: v6e:2x2x1
jax: 0.10.0
libtpu: 0.0.40
codegen_flags: <defaults>
</compile_context>

<pallas_src>
import jax
import jax.numpy as jnp
from jax.experimental import pallas as pl
from jax.experimental.pallas import tpu as pltpu

EMBED = 64
H1 = 32
H2 = 16
EPS = 1e-5

# ---- compact parameter-slab layout (72 rows x 128 lanes, f32) ---------------
R_W1, C_W1 = 0, 0          # rows 0..63 , lanes  0..31 : w1 (64, 32)
R_W2, C_W2 = 0, 32         # rows 0..31 , lanes 32..47 : w2 (32, 16)
R_V0 = 64                  # vector row 0
C_B1, C_G1, C_BE1 = 0, 32, 64          # b1 / gamma1 / beta1  (32 lanes each)
C_B2, C_G2 = 96, 112                   # b2 / gamma2          (16 lanes each)
R_V1 = 65                  # vector row 1
C_BE2, C_W3, C_B3 = 0, 16, 32          # beta2 / w3-row / b3
SLAB_ROWS = 72             # multiple of 8
SLAB_COLS = 128            # one lane tile


def binary_classification_kernel(x_ref, p_ref, o_ref):
    x = x_ref[...]                                        # (B, 64) f32
    inv_b = 1.0 / x.shape[0]

    # static views into the packed parameter slab
    w1 = p_ref[R_W1:R_W1 + EMBED, C_W1:C_W1 + H1]         # (64, 32)
    w2 = p_ref[R_W2:R_W2 + H1, C_W2:C_W2 + H2]            # (32, 16)
    b1 = p_ref[R_V0:R_V0 + 1, C_B1:C_B1 + H1]             # (1, 32)
    g1 = p_ref[R_V0:R_V0 + 1, C_G1:C_G1 + H1]
    be1 = p_ref[R_V0:R_V0 + 1, C_BE1:C_BE1 + H1]
    b2 = p_ref[R_V0:R_V0 + 1, C_B2:C_B2 + H2]             # (1, 16)
    g2 = p_ref[R_V0:R_V0 + 1, C_G2:C_G2 + H2]
    be2 = p_ref[R_V1:R_V1 + 1, C_BE2:C_BE2 + H2]
    w3r = p_ref[R_V1:R_V1 + 1, C_W3:C_W3 + H2]            # (1, 16)
    b3 = p_ref[R_V1:R_V1 + 1, C_B3:C_B3 + 1]              # (1, 1)

    # layer_1 + ReLU + batchnorm1 (single-pass stats, folded scale, all f32)
    h1 = jnp.dot(x, w1, preferred_element_type=jnp.float32) + b1
    h1 = jnp.maximum(h1, 0.0)
    m1 = jnp.sum(h1, axis=0, keepdims=True) * inv_b
    v1 = jnp.maximum(jnp.sum(h1 * h1, axis=0, keepdims=True) * inv_b - m1 * m1, 0.0)
    scale1 = jax.lax.rsqrt(v1 + EPS) * g1                 # rsqrt rides the EUP slot
    h1 = h1 * scale1 + (be1 - m1 * scale1)

    # layer_2 + ReLU; batchnorm2 folded together with layer_out (N=1, VPU/XLU)
    h2 = jnp.dot(h1, w2, preferred_element_type=jnp.float32) + b2
    h2 = jnp.maximum(h2, 0.0)
    m2 = jnp.sum(h2, axis=0, keepdims=True) * inv_b
    v2 = jnp.maximum(jnp.sum(h2 * h2, axis=0, keepdims=True) * inv_b - m2 * m2, 0.0)
    scale2 = jax.lax.rsqrt(v2 + EPS) * g2
    shift2 = be2 - m2 * scale2
    w_fold = scale2 * w3r                                          # (1, 16)
    shift_dot = jnp.sum(shift2 * w3r, axis=-1, keepdims=True) + b3  # (1, 1)
    out = jnp.sum(h2 * w_fold, axis=-1, keepdims=True) + shift_dot  # (B, 1)
    o_ref[...] = out.astype(o_ref.dtype)


def pack_params(p):
    """Pack every parameter into one compact (72, 128) f32 slab -> a single DMA."""
    slab = jnp.zeros((SLAB_ROWS, SLAB_COLS), jnp.float32)
    slab = slab.at[R_W1:R_W1 + EMBED, C_W1:C_W1 + H1].set(p["w1"])
    slab = slab.at[R_W2:R_W2 + H1, C_W2:C_W2 + H2].set(p["w2"])
    slab = slab.at[R_V0, C_B1:C_B1 + H1].set(p["b1"][0])
    slab = slab.at[R_V0, C_G1:C_G1 + H1].set(p["g1"][0])
    slab = slab.at[R_V0, C_BE1:C_BE1 + H1].set(p["be1"][0])
    slab = slab.at[R_V0, C_B2:C_B2 + H2].set(p["b2"][0])
    slab = slab.at[R_V0, C_G2:C_G2 + H2].set(p["g2"][0])
    slab = slab.at[R_V1, C_BE2:C_BE2 + H2].set(p["be2"][0])
    slab = slab.at[R_V1, C_W3:C_W3 + H2].set(p["w3"][:, 0])
    slab = slab.at[R_V1, C_B3].set(p["b3"][0, 0])
    return slab


def binary_classification_batched(x_groups, param_slab):
    """x_groups: (G, B, 64) independent batches -> (G, B, 1).

    BatchNorm statistics are computed per group, i.e. exactly the same as
    calling the PyTorch module once per batch of size B (training mode)."""
    G, B, _ = x_groups.shape
    return pl.pallas_call(
        binary_classification_kernel,
        out_shape=jax.ShapeDtypeStruct((G, B, 1), jnp.float32),
        grid=(G,),
        in_specs=[
            pl.BlockSpec((None, B, EMBED), lambda i: (i, 0, 0)),
            pl.BlockSpec((SLAB_ROWS, SLAB_COLS), lambda i: (0, 0)),  # resident
        ],
        out_specs=pl.BlockSpec((None, B, 1), lambda i: (i, 0, 0)),
        compiler_params=pltpu.CompilerParams(
            dimension_semantics=("parallel",),      # v7x dual-TC sharding
            vmem_limit_bytes=4 * 1024 * 1024,       # ~80 KiB working set + headroom
        ),
    )(x_groups, param_slab)


def binary_classification(x, param_slab):
    """Single-batch entry matching the PyTorch forward: (B, 64) -> (B, 1)."""
    return binary_classification_batched(x[None], param_slab)[0]


def init_params(key):
    """Deterministic init; weights stored pre-transposed as (in, out)."""
    ks = jax.random.split(key, 6)

    def linear(kw, kb, fan_in, fan_out):
        bound = 1.0 / jnp.sqrt(fan_in)
        w = jax.random.uniform(kw, (fan_in, fan_out), jnp.float32, -bound, bound)
        b = jax.random.uniform(kb, (1, fan_out), jnp.float32, -bound, bound)
        return w, b

    w1, b1 = linear(ks[0], ks[1], EMBED, H1)
    w2, b2 = linear(ks[2], ks[3], H1, H2)
    w3, b3 = linear(ks[4], ks[5], H2, 1)
    return {
        "w1": w1, "b1": b1,
        "g1": jnp.ones((1, H1), jnp.float32), "be1": jnp.zeros((1, H1), jnp.float32),
        "w2": w2, "b2": b2,
        "g2": jnp.ones((1, H2), jnp.float32), "be2": jnp.zeros((1, H2), jnp.float32),
        "w3": w3, "b3": b3,
    }


def reference(x, p):
    """Pure-JAX reference for one batch (PyTorch two-pass BN, training mode)."""
    def bn(h, g, b):
        mean = jnp.mean(h, axis=0, keepdims=True)
        var = jnp.mean((h - mean) ** 2, axis=0, keepdims=True)
        return (h - mean) * jax.lax.rsqrt(var + EPS) * g + b

    h1 = jnp.maximum(x @ p["w1"] + p["b1"], 0.0)
    h1 = bn(h1, p["g1"], p["be1"])
    h2 = jnp.maximum(h1 @ p["w2"] + p["b2"], 0.0)
    h2 = bn(h2, p["g2"], p["be2"])
    return h2 @ p["w3"] + p["b3"]


if __name__ == "__main__":
    key = jax.random.PRNGKey(0)
    k_x, k_p = jax.random.split(key)

    G, B = 4, 8   # 4 independent small batches of 8
    x_groups = jax.random.normal(k_x, (G, B, EMBED), jnp.float32)
    params = init_params(k_p)
    slab = pack_params(params)  # one-time packing -> single parameter DMA

    out = jax.block_until_ready(binary_classification_batched(x_groups, slab))
    ref = jax.vmap(lambda xb: reference(xb, params))(x_groups)
    assert out.shape == (G, B, 1)
    assert jnp.allclose(out, ref, atol=1e-4, rtol=1e-4), (out, ref)

    # single-batch path matching the PyTorch forward signature
    out1 = jax.block_until_ready(binary_classification(x_groups[0], slab))
    assert out1.shape == (B, 1)
    assert jnp.allclose(out1, ref[0], atol=1e-4, rtol=1e-4), (out1, ref[0])

    print("KERNEL_OK")
</pallas_src>

<mosaic_0001>
module attributes {stable_mosaic.version = 11 : i64} {
  func.func @binary_classification_kernel(%arg0: i32, %arg1: memref<1x8x64xf32, #tpu.memory_space<vmem>>, %arg2: memref<72x128xf32, #tpu.memory_space<vmem>>, %arg3: memref<1x8x1xf32, #tpu.memory_space<vmem>>) attributes {dimension_semantics = [#tpu.dimension_semantics<parallel>], iteration_bounds = array<i64: 4>, scalar_prefetch = 0 : i64, scratch_operands = 0 : i64, tpu.core_type = #tpu.core_type<tc>, window_params = [{transform_indices = @transform_0, window_bounds = array<i64: 1, 8, 64>}, {pipeline_mode = #tpu.pipeline_mode<synchronous>, transform_indices = @transform_1, window_bounds = array<i64: 72, 128>}, {transform_indices = @transform_2, window_bounds = array<i64: 1, 8, 1>}]} {
    %c0 = arith.constant 0 : index
    %c0_0 = arith.constant 0 : index
    %c0_1 = arith.constant 0 : index
    %0 = vector.load %arg1[%c0, %c0_0, %c0_1] : memref<1x8x64xf32, #tpu.memory_space<vmem>>, vector<1x8x64xf32>
    %1 = vector.shape_cast %0 : vector<1x8x64xf32> to vector<8x64xf32>
    %c0_2 = arith.constant 0 : index
    %c0_3 = arith.constant 0 : index
    %2 = vector.load %arg2[%c0_2, %c0_3] : memref<72x128xf32, #tpu.memory_space<vmem>>, vector<64x32xf32>
    %c0_4 = arith.constant 0 : index
    %c32 = arith.constant 32 : index
    %3 = vector.load %arg2[%c0_4, %c32] : memref<72x128xf32, #tpu.memory_space<vmem>>, vector<32x16xf32>
    %c64 = arith.constant 64 : index
    %c0_5 = arith.constant 0 : index
    %4 = vector.load %arg2[%c64, %c0_5] : memref<72x128xf32, #tpu.memory_space<vmem>>, vector<1x32xf32>
    %c64_6 = arith.constant 64 : index
    %c32_7 = arith.constant 32 : index
    %5 = vector.load %arg2[%c64_6, %c32_7] : memref<72x128xf32, #tpu.memory_space<vmem>>, vector<1x32xf32>
    %c64_8 = arith.constant 64 : index
    %c64_9 = arith.constant 64 : index
    %6 = vector.load %arg2[%c64_8, %c64_9] : memref<72x128xf32, #tpu.memory_space<vmem>>, vector<1x32xf32>
    %c64_10 = arith.constant 64 : index
    %c96 = arith.constant 96 : index
    %7 = vector.load %arg2[%c64_10, %c96] : memref<72x128xf32, #tpu.memory_space<vmem>>, vector<1x16xf32>
    %c64_11 = arith.constant 64 : index
    %c112 = arith.constant 112 : index
    %8 = vector.load %arg2[%c64_11, %c112] : memref<72x128xf32, #tpu.memory_space<vmem>>, vector<1x16xf32>
    %c65 = arith.constant 65 : index
    %c0_12 = arith.constant 0 : index
    %9 = vector.load %arg2[%c65, %c0_12] : memref<72x128xf32, #tpu.memory_space<vmem>>, vector<1x16xf32>
    %c65_13 = arith.constant 65 : index
    %c16 = arith.constant 16 : index
    %10 = vector.load %arg2[%c65_13, %c16] : memref<72x128xf32, #tpu.memory_space<vmem>>, vector<1x16xf32>
    %c65_14 = arith.constant 65 : index
    %c32_15 = arith.constant 32 : index
    %11 = vector.load %arg2[%c65_14, %c32_15] : memref<72x128xf32, #tpu.memory_space<vmem>>, vector<1x1xf32>
    %cst = arith.constant dense<0.000000e+00> : vector<8x32xf32>
    %12 = tpu.matmul %1, %2, %cst {dimension_numbers = #tpu.dot_dimension_numbers<[1], [0], [0], [1], [0, 0, 1, 1], [], []>} : vector<8x64xf32>, vector<64x32xf32>, vector<8x32xf32> -> vector<8x32xf32>
    %13 = vector.broadcast %4 : vector<1x32xf32> to vector<8x32xf32>
    %14 = arith.addf %12, %13 : vector<8x32xf32>
    %cst_16 = arith.constant 0.000000e+00 : f32
    %15 = vector.broadcast %cst_16 : f32 to vector<8x32xf32>
    %16 = arith.maximumf %14, %15 : vector<8x32xf32>
    %cst_17 = arith.constant dense<0.000000e+00> : vector<32xf32>
    %17 = vector.multi_reduction <add>, %16, %cst_17 [0] : vector<8x32xf32> to vector<32xf32>
    %18 = vector.shape_cast %17 : vector<32xf32> to vector<1x32xf32>
    %cst_18 = arith.constant 1.250000e-01 : f32
    %19 = vector.broadcast %cst_18 : f32 to vector<1x32xf32>
    %20 = arith.mulf %18, %19 : vector<1x32xf32>
    %21 = arith.mulf %16, %16 : vector<8x32xf32>
    %cst_19 = arith.constant dense<0.000000e+00> : vector<32xf32>
    %22 = vector.multi_reduction <add>, %21, %cst_19 [0] : vector<8x32xf32> to vector<32xf32>
    %23 = vector.shape_cast %22 : vector<32xf32> to vector<1x32xf32>
    %cst_20 = arith.constant 1.250000e-01 : f32
    %24 = vector.broadcast %cst_20 : f32 to vector<1x32xf32>
    %25 = arith.mulf %23, %24 : vector<1x32xf32>
    %26 = arith.mulf %20, %20 : vector<1x32xf32>
    %27 = arith.subf %25, %26 : vector<1x32xf32>
    %cst_21 = arith.constant 0.000000e+00 : f32
    %28 = vector.broadcast %cst_21 : f32 to vector<1x32xf32>
    %29 = arith.maximumf %27, %28 : vector<1x32xf32>
    %cst_22 = arith.constant 9.99999974E-6 : f32
    %30 = vector.broadcast %cst_22 : f32 to vector<1x32xf32>
    %31 = arith.addf %29, %30 : vector<1x32xf32>
    %32 = math.rsqrt %31 : vector<1x32xf32>
    %33 = arith.mulf %32, %5 : vector<1x32xf32>
    %34 = vector.broadcast %33 : vector<1x32xf32> to vector<8x32xf32>
    %35 = arith.mulf %16, %34 : vector<8x32xf32>
    %36 = arith.mulf %20, %33 : vector<1x32xf32>
    %37 = arith.subf %6, %36 : vector<1x32xf32>
    %38 = vector.broadcast %37 : vector<1x32xf32> to vector<8x32xf32>
    %39 = arith.addf %35, %38 : vector<8x32xf32>
    %cst_23 = arith.constant dense<0.000000e+00> : vector<8x16xf32>
    %40 = tpu.matmul %39, %3, %cst_23 {dimension_numbers = #tpu.dot_dimension_numbers<[1], [0], [0], [1], [0, 0, 1, 1], [], []>} : vector<8x32xf32>, vector<32x16xf32>, vector<8x16xf32> -> vector<8x16xf32>
    %41 = vector.broadcast %7 : vector<1x16xf32> to vector<8x16xf32>
    %42 = arith.addf %40, %41 : vector<8x16xf32>
    %cst_24 = arith.constant 0.000000e+00 : f32
    %43 = vector.broadcast %cst_24 : f32 to vector<8x16xf32>
    %44 = arith.maximumf %42, %43 : vector<8x16xf32>
    %cst_25 = arith.constant dense<0.000000e+00> : vector<16xf32>
    %45 = vector.multi_reduction <add>, %44, %cst_25 [0] : vector<8x16xf32> to vector<16xf32>
    %46 = vector.shape_cast %45 : vector<16xf32> to vector<1x16xf32>
    %cst_26 = arith.constant 1.250000e-01 : f32
    %47 = vector.broadcast %cst_26 : f32 to vector<1x16xf32>
    %48 = arith.mulf %46, %47 : vector<1x16xf32>
    %49 = arith.mulf %44, %44 : vector<8x16xf32>
    %cst_27 = arith.constant dense<0.000000e+00> : vector<16xf32>
    %50 = vector.multi_reduction <add>, %49, %cst_27 [0] : vector<8x16xf32> to vector<16xf32>
    %51 = vector.shape_cast %50 : vector<16xf32> to vector<1x16xf32>
    %cst_28 = arith.constant 1.250000e-01 : f32
    %52 = vector.broadcast %cst_28 : f32 to vector<1x16xf32>
    %53 = arith.mulf %51, %52 : vector<1x16xf32>
    %54 = arith.mulf %48, %48 : vector<1x16xf32>
    %55 = arith.subf %53, %54 : vector<1x16xf32>
    %cst_29 = arith.constant 0.000000e+00 : f32
    %56 = vector.broadcast %cst_29 : f32 to vector<1x16xf32>
    %57 = arith.maximumf %55, %56 : vector<1x16xf32>
    %cst_30 = arith.constant 9.99999974E-6 : f32
    %58 = vector.broadcast %cst_30 : f32 to vector<1x16xf32>
    %59 = arith.addf %57, %58 : vector<1x16xf32>
    %60 = math.rsqrt %59 : vector<1x16xf32>
    %61 = arith.mulf %60, %8 : vector<1x16xf32>
    %62 = arith.mulf %48, %61 : vector<1x16xf32>
    %63 = arith.subf %9, %62 : vector<1x16xf32>
    %64 = arith.mulf %61, %10 : vector<1x16xf32>
    %65 = arith.mulf %63, %10 : vector<1x16xf32>
    %cst_31 = arith.constant dense<0.000000e+00> : vector<1xf32>
    %66 = vector.multi_reduction <add>, %65, %cst_31 [1] : vector<1x16xf32> to vector<1xf32>
    %67 = vector.shape_cast %66 : vector<1xf32> to vector<1x1xf32>
    %68 = arith.addf %67, %11 : vector<1x1xf32>
    %69 = vector.broadcast %64 : vector<1x16xf32> to vector<8x16xf32>
    %70 = arith.mulf %44, %69 : vector<8x16xf32>
    %cst_32 = arith.constant dense<0.000000e+00> : vector<8xf32>
    %71 = vector.multi_reduction <add>, %70, %cst_32 [1] : vector<8x16xf32> to vector<8xf32>
    %72 = vector.shape_cast %71 : vector<8xf32> to vector<8x1xf32>
    %73 = vector.broadcast %68 : vector<1x1xf32> to vector<8x1xf32>
    %74 = arith.addf %72, %73 : vector<8x1xf32>
    %c0_33 = arith.constant 0 : index
    %c0_34 = arith.constant 0 : index
    %c0_35 = arith.constant 0 : index
    %75 = vector.load %arg3[%c0_33, %c0_34, %c0_35] : memref<1x8x1xf32, #tpu.memory_space<vmem>>, vector<1x8x1xf32>
    %76 = vector.shape_cast %75 : vector<1x8x1xf32> to vector<8x1xf32>
    %77 = vector.shape_cast %74 : vector<8x1xf32> to vector<1x8x1xf32>
    tpu.vector_store %arg3[%c0_33, %c0_34, %c0_35], %77 {strides = array<i32>} : memref<1x8x1xf32, #tpu.memory_space<vmem>>, vector<1x8x1xf32>,
    return
  }
  func.func @transform_0(%arg0: i32) -> (i32, i32, i32) {
    %c0_i32 = arith.constant 0 : i32
    %c0_i32_0 = arith.constant 0 : i32
    %c0_i32_1 = arith.constant 0 : i32
    return %arg0, %c0_i32, %c0_i32_0 : i32, i32, i32
  }
  func.func @transform_1(%arg0: i32) -> (i32, i32) {
    %c0_i32 = arith.constant 0 : i32
    %c0_i32_0 = arith.constant 0 : i32
    %c0_i32_1 = arith.constant 0 : i32
    return %c0_i32, %c0_i32_0 : i32, i32
  }
  func.func @transform_2(%arg0: i32) -> (i32, i32, i32) {
    %c0_i32 = arith.constant 0 : i32
    %c0_i32_0 = arith.constant 0 : i32
    %c0_i32_1 = arith.constant 0 : i32
    return %arg0, %c0_i32, %c0_i32_0 : i32, i32, i32
  }
}

</mosaic_0001>

<bundles_post_ra>
// kernel: tpu_custom_call.1
= control target key start
LH: loop header
LB: loop body
LE: loop exit
PB: predicated region body
PF: predicated region fallthrough
CT: control target
= control target key end

     0   :  { %7 = vsyncpa [#allocation3], 0  ;;  %s942_s0 = inlined_call_operand.hbm [shape: f32[4,8,64], index: 0, kind: input, shape index: {}]   ;;  %s943_s1 = inlined_call_operand.hbm [shape: f32[72,128], index: 1, kind: input, shape index: {}]   ;;  %s944_s2 = inlined_call_operand.vmem [shape: f32[4,8,1], index: 2, kind: output, shape index: {}]  }
   0x1   :  { %9 = vsyncpa [#allocation3 + $0x1], 0 }
   0x2   :  { %10 = vsyncpa [#allocation5], 0  ;;  %s781_s9 = smov 0   ;;  %s783_s10 = smov 0  }
   0x3   :  { %s785_s11 = smov 0   ;;  %s787_s12 = smov 0  }
   0x4 LB: > { %s800_s13 = sadd.s32 4294967295, %s753_s12   ;;  %p36_p0 = scmp.ne.s32.totalorder %s745_s10, %s741_s9  ;;  %s753_s12 = sphi %s787_s12, %s959_s12   ;;  %s749_s11 = sphi %s785_s11, %s958_s11   ;;  %s745_s10 = sphi %s783_s10, %s957_s10   ;;  %s741_s9 = sphi %s781_s9, %s956_s9  }
   0x5   : > { %p945_p1 = scmp.eq.s32.totalorder %s800_s13, 0  ;;  %p541_p2 = scmp.ge.s32.totalorder %s753_s12, 1 }
   0x6   : > { %p94_p3 = scmp.lt.s32.totalorder %s753_s12, 5  ;;  %s755_s16 = smov [#allocation4]  }
   0x7   : > { %p808_p4 = por %p945_p1, %p36_p0  ;;  %s106_s17 = sshll.u32 %s755_s16, 4  ;;  %s107_s17 = int_to_ptr.vmem [resolvable:$true] %s106_s17 }
   0x8   : > { %p812_p5 = pnand %p541_p2, %p94_p3  ;;  %s825_s19 = sadd.s32 1, %s753_s12  }
   0x9   : > { %s948_s14 = scalar_select %p808_p4, 1, 0 }
   0xa   : > { %s949_s15 = scalar_select %p812_p5, 1, 0 }
   0xb   : > { %p604_p6 = pneg %p812_p5  ;;  %s23_s20 = sadd.s32 1, %s749_s11 }
   0xc   : > { %s20_s21 = ssub.s32 %s753_s12, %s825_s19  ;;  %s672_s22 = scalar_lea.vmem %s107_s17, 1152 }
   0xd   : > { %p820_p7 = pnand %p604_p6, %p945_p1  ;;  %p673_p9 = scmp.ne.s32.totalorder %s107_s17, %s672_s22 }
   0xe   : > { %p680_p12 = scmp.lt.s32.totalorder %s107_s17, %s107_s17  ;;  %p681_p13 = scmp.lt.s32.totalorder %s672_s22, %s672_s22 }
   0xf   : > { %p663_p8 = pneg %p820_p7 }
  0x10   : > { %p682_p0 = por %p681_p13, %p680_p12 }
  0x11   : > { %p675_p10 = pnand %p673_p9, %p663_p8 }
  0x13   : > { %p676_p11 = pneg %p675_p10 }
  0x15   : > { %p683_p2 = pnand %p682_p0, %p676_p11 }
  0x17   : > { %686 = shalt.err (!%p683_p2)
}
  0x18   : > { %s756_s23 = smov 128   ;;  %s757_s24 = smov 8  }
  0x19   : > { %607 = dma.hbm_to_vmem [thread:$0]  (!%p820_p7), %s943_s1, 1152, %s107_s17, [#allocation5], %s756_s23, %s756_s23, %s757_s24  }
  0x1a   : > { %p21_p3 = scmp.eq.s32.totalorder %s20_s21, 0  ;;  %p30_p6 = scmp.ne.s32.totalorder %s749_s11, %s745_s10 }
  0x1b   : > { %p31_p8 = scmp.eq.s32.totalorder %s753_s12, 0  ;;  %p613_p9 = scmp.lt.s32.totalorder %s753_s12, 4 }
  0x1c   : > { %s842_s27 = scalar_select %p21_p3, %s749_s11, %s23_s20  }
  0x1d   : > { %p32_p10 = por %p31_p8, %p30_p6  ;;  %s120_s28 = sand.u32 1, %s749_s11  }
  0x1e   : > { %s544_s29 = sshll.u32 %s120_s28, 3  ;;  %s545_s30 = sshll.u32 %s753_s12, 7 }
  0x1f   : > { %s849_s5 = scalar_lea.hbm %s942_s0, %s545_s30  ;;  %s124_s6 = scalar_lea.vmem [#allocation2], %s544_s29 }
  0x20   : > { %s131_s7 = sshll.u32 %s124_s6, 4  ;;  %p851_p7 = pnand %p613_p9, %p32_p10  ;;  %s132_s7 = int_to_ptr.vmem [resolvable:$true] %s131_s7 }
  0x21   : > { %s121_s9 = scalar_lea.sflag [#allocation3], %s120_s28  ;;  %s687_s16 = scalar_lea.hbm %s849_s5, 128 }
  0x22   : > { %p688_p11 = scmp.ne.s32.totalorder %s849_s5, %s687_s16  ;;  %p689_p12 = pneg %p851_p7 }
  0x23   : > { %s692_s18 = scalar_lea.hbm %s942_s0, 512  ;;  %p693_p2 = scmp.lt.s32.totalorder %s849_s5, %s942_s0 }
  0x24   : > { %p690_p13 = pnand %p689_p12, %p688_p11  ;;  %p694_p3 = scmp.lt.s32.totalorder %s692_s18, %s687_s16 }
  0x26   : > { %p691_p0 = pneg %p690_p13  ;;  %p695_p6 = por %p694_p3, %p693_p2 }
  0x28   : > { %p696_p8 = pnand %p695_p6, %p691_p0 }
  0x2a   : > { %699 = shalt.err (!%p696_p8)
}
  0x2b   : > { %s700_s22 = scalar_lea.vmem %s132_s7, 128  ;;  %s758_s23 = smov [#allocation2]  }
  0x2c   : > { %p701_p9 = scmp.ne.s32.totalorder %s132_s7, %s700_s22  ;;  %s705_s24 = sshll.u32 %s758_s23, 4  ;;  %s706_s24 = int_to_ptr.vmem [resolvable:$false] %s705_s24 }
  0x2d   : > { %s707_s25 = scalar_lea.vmem %s706_s24, 256  ;;  %p708_p11 = scmp.lt.s32.totalorder %s132_s7, %s706_s24 }
  0x2e   : > { %p703_p10 = pnand %p701_p9, %p689_p12  ;;  %p709_p13 = scmp.lt.s32.totalorder %s707_s25, %s700_s22 }
  0x30   : > { %p704_p1 = pneg %p703_p10  ;;  %p710_p4 = por %p709_p13, %p708_p11 }
  0x32   : > { %p711_p5 = pnand %p710_p4, %p704_p1 }
  0x34   : > { %714 = shalt.err (!%p711_p5)
}
  0x35   : > { %611 = dma.hbm_to_vmem [thread:$0]  (!%p851_p7), %s849_s5, 128, %s132_s7, %s121_s9  }
  0x36   : > { %p952_p0 = scmp.ne.s32.totalorder %s949_s15, 0 }
  0x37   : > { %s142_s26 = sand.u32 (!%p952_p0), 1, %s745_s10   ;;  %p953_p12 = scmp.ne.s32.totalorder (!%p952_p0), %s948_s14, 0 }
  0x38   : > { %140 = sbr.rel (%p952_p0) target bundleno = 1060 (0x424), region = 28  ;;  %s872_s28 = sshll.u32 (!%p952_p0), %s142_s26, 3 }
  0x39   : > { %s143_s29 = scalar_lea.sflag (!%p952_p0), [#allocation3], %s142_s26  ;;  %s146_s30 = scalar_lea.vmem (!%p952_p0), [#allocation2], %s872_s28 }
  0x3d   : > { %732 = dma.done.wait (%p953_p12), %s143_s29, 128  }
  0x3e   : > { %734 = vsyncadd (%p953_p12), %s143_s29, 4294967168  ;;  %p954_p1 = scmp.eq.s32.totalorder %s800_s13, 0 }
  0x40   : > { %736 = dma.done.wait (%p954_p1), [#allocation5], 1152   ;;  %p955_p4 = pmov %p954_p1 }
  0x41   : > { %v759_v0 = vmov 0.0   ;;  %vm760_vm0 = vmmov 0   ;;  %v182_v1 = vld [vmem:[#allocation4 + $0x38] sm:$0xff]  ;;  %v181_v2 = vld [vmem:[#allocation4 + $0x30] sm:$0xff]  ;;  %v180_v4 = vld [vmem:[#allocation4 + $0x28] sm:$0xff]  ;;  %s761_s14 = smov 96   ;;  %v185_v11 = vlaneseq }
  0x42   : > { %738 = vsyncadd (%p955_p4), [#allocation5], 4294966144  ;;  %568 = vmatprep.subr.mxu0 %v759_v0  ;;  %584 = vmatprep.mubr.msk.f32.mxu0 %vm760_vm0, %v759_v0  ;;  %v178_v3 = vld [vmem:[#allocation4 + $0x18] sm:$0xff]  ;;  %v889_v5 = vld [vmem:[#allocation4 + $0x40] sm:$0x1]  ;;  %vm189_vm1 = vcmask 523264  }
  0x43   : > { %587 = vmatprep.subr.mxu1 %v759_v0  ;;  %595 = vmatprep.mubr.msk.f32.mxu1 %vm760_vm0, %v759_v0  ;;  %v179_v6 = vld [vmem:[#allocation4 + $0x20] sm:$0xff]  ;;  %v177_v7 = vld [vmem:[#allocation4 + $0x10] sm:$0xff]  ;;  %v176_v8 = vld [vmem:[#allocation4 + $0x8] sm:$0xff]  ;;  %v186_v12 = vshrl.u32 %v185_v11, 7  ;;  %vm264_vm2 = vcmask 261120   ;;  %s762_s15 = smov 64  }
  0x44   : > { %569 = vmatpush3.msra.mxu0 %v182_v1  ;;  %322 = vrot.lane.b32.xlu1 %v178_v3, %s761_s14  ;;  %v175_v9 = vld [vmem:[#allocation4] sm:$0xff]  ;;  %v174_v10 = vld [vmem:[%s146_s30] sm:$0xff]  ;;  %s763_s3 = smov 16   ;;  %s764_s4 = smov 32   ;;  %vm406_vm3 = vcmask 130048   ;;  %vm441_vm4 = vcmask 122880  }
  0x45   : > { %570 = vmatprep.subr.mxu0 %v759_v0  ;;  %288 = vrot.lane.b32.xlu0 %v889_v5, %s761_s14  ;;  %v902_v13 = vsub.s32 0, %v186_v12  ;;  %v184_v53 = vld [vmem:[#allocation4 + $0x41] sm:$0x1]  ;;  %s765_s5 = smov 112   ;;  %p170_p5 = scmp.lt.s32.totalorder %s800_s13, 3  ;;  %vm463_vm5 = vcmask 7168  }
  0x46   : > { %571 = vmatpush3.msra.mxu0 %v181_v2 }
  0x47   : > { %572 = vmatprep.subr.mxu0 %v759_v0  ;;  %v188_v14 = vrot.slane %v889_v5, %v902_v13  ;;  %s961_s13 = smov (!%p170_p5, %s800_s13), 3 }
  0x48   : > { %573 = vmatpush3.msra.mxu0 %v180_v4  ;;  %320 = vrot.lane.b32.xlu1 %v177_v7, %s761_s14  ;;  %s549_s6 = sshll.u32 %s961_s13, 3 }
  0x49   : > { %574 = vmatprep.subr.mxu0 %v759_v0  ;;  %s173_s9 = scalar_lea.vmem %s944_s2, %s549_s6 }
  0x4a   : > { %575 = vmatpush3.msra.mxu0 %v179_v6 }
  0x4b   : > { %576 = vmatprep.subr.mxu0 %v759_v0 }
  0x4c   : > { %577 = vmatpush3.msra.mxu0 %v178_v3 }
  0x4d   : > { %578 = vmatprep.subr.mxu0 %v759_v0 }
  0x4e   : > { %579 = vmatpush3.msra.mxu0 %v177_v7 }
  0x4f   : > { %580 = vmatprep.subr.mxu0 %v759_v0 }
  0x50   : > { %581 = vmatpush3.msra.mxu0 %v176_v8 }
  0x51   : > { %582 = vmatprep.subr.mxu0 %v759_v0 }
  0x52   : > { %583 = vmatpush3.msra.mxu0 %v175_v9 }
  0x53   : > { %585 = vmatmul.mubr.msk.f32.vlgmr.msra.gmra.mxu0 %vm189_vm1, %v174_v10 }
  0xb6   : > { %v323_v40 = vpop.permute.xlu1 %322 }
  0xb7   : > { %588 = vmatpush3.msra.mxu1 %v323_v40  ;;  %v289_v41 = vpop.permute.xlu0 %288 }
  0xb8   : > { %589 = vmatprep.subr.mxu1 %v759_v0 }
  0xba   : > { %v321_v43 = vpop.permute.xlu1 %320 }
  0xbb   : > { %590 = vmatpush3.msra.mxu1 %v321_v43 }
  0xbc   : > { %591 = vmatprep.subr.mxu1 %v759_v0 }
 0x113   : > { %v259_v15 = vpop.f32.mrf.mxu0 }
 0x114   : > { %v260_v16 = vadd.f32 %v259_v15, %v188_v14 }
 0x115   : > { %v586_v17 = vpop.f32.mrf.mxu0 }
 0x116   : > { %v263_v18 = vmax.f32 %v260_v16, 0.0 }
 0x118   : > { %v265_v19 = vsel %vm264_vm2, %v263_v18, 0.0  ;;  %v273_v20 = vmul.f32 %v263_v18, %v263_v18 }
 0x119   : > { %v266_v21 = vrot.slane %v265_v19, 4 }
 0x11a   : > { %v274_v22 = vsel %vm264_vm2, %v273_v20, 0.0 }
 0x11b   : > { %v267_v23 = vadd.f32 %v266_v21, %v265_v19  ;;  %v275_v24 = vrot.slane %v274_v22, 4 }
 0x11d   : > { %v268_v25 = vrot.slane %v267_v23, 2  ;;  %v276_v26 = vadd.f32 %v275_v24, %v274_v22 }
 0x11f   : > { %v277_v27 = vrot.slane %v276_v26, 2  ;;  %v269_v28 = vadd.f32 %v268_v25, %v267_v23 }
 0x121   : > { %v278_v29 = vadd.f32 %v277_v27, %v276_v26  ;;  %v270_v30 = vrot.slane %v269_v28, 1 }
 0x123   : > { %v279_v31 = vrot.slane %v278_v29, 1  ;;  %v271_v32 = vadd.f32 %v270_v30, %v269_v28 }
 0x125   : > { %v272_v33 = vmul.f32 0.125, %v271_v32  ;;  %v280_v34 = vadd.f32 %v279_v31, %v278_v29 }
 0x127   : > { %v281_v35 = vmul.f32 0.125, %v280_v34  ;;  %v282_v36 = vmul.f32 %v272_v33, %v272_v33 }
 0x129   : > { %v283_v37 = vsub.f32 %v281_v35, %v282_v36 }
 0x12b   : > { %v284_v38 = vmax.f32 %v283_v37, 0.0 }
 0x12d   : > { %v285_v39 = vadd.f32 1e-05, %v284_v38 }
 0x12f   : > { %657 = vrsqrt.f32 %v285_v39 }
 0x13c   : > { %v658_v42 = vpop.eup %657 }
 0x13d   : > { %v291_v44 = vmul.f32 %v658_v42, %v289_v41 }
 0x13f   : > { %v295_v45 = vrot.slane %v291_v44, %v902_v13  ;;  %v297_v46 = vmul.f32 %v291_v44, %v272_v33 }
 0x141   : > { %299 = vrot.lane.b32.xlu0 %v297_v46, %s762_s15  ;;  %v296_v47 = vmul.f32 %v295_v45, %v263_v18 }
 0x145   : > { %318 = vrot.lane.b32.xlu0 %v176_v8, %s761_s14 }
 0x149   : > { %316 = vrot.lane.b32.xlu0 %v175_v9, %s761_s14 }
 0x14d   : > { %429 = vrot.lane.b32.xlu0 %v889_v5, %s763_s3 }
 0x1b3   : > { %v300_v48 = vpop.permute.xlu0 %299 }
 0x1b4   : > { %v302_v49 = vsub.f32 %v889_v5, %v300_v48 }
 0x1b6   : > { %v306_v50 = vrot.slane %v302_v49, %v902_v13 }
 0x1b7   : > { %v319_v51 = vpop.permute.xlu0 %318 }
 0x1b8   : > { %308 = vrot.lane.b32.xlu1 %v306_v50, %s762_s15  ;;  %592 = vmatpush3.msra.mxu1 %v319_v51 }
 0x1b9   : > { %593 = vmatprep.subr.mxu1 %v759_v0 }
 0x1bb   : > { %v317_v52 = vpop.permute.xlu0 %316 }
 0x1bc   : > { %594 = vmatpush3.msra.mxu1 %v317_v52  ;;  %329 = vrot.lane.b32.xlu1 %v188_v14, %s764_s4 }
 0x1bf   : > { %v430_v19 = vpop.permute.xlu0 %429 }
 0x1c0   : > { %436 = vrot.lane.b32.xlu1 %v184_v53, %s765_s5 }
 0x22a   : > { %v309_v54 = vpop.permute.xlu1 %308 }
 0x22b   : > { %v311_v55 = vadd.f32 %v309_v54, %v296_v47 }
 0x22d   : > { %596 = vmatmul.mubr.msk.f32.vlgmr.msra.gmra.mxu1 %vm264_vm2, %v311_v55 }
 0x22e   : > { %v330_v56 = vpop.permute.xlu1 %329 }
 0x232   : > { %v437_v21 = vpop.permute.xlu1 %436 }
 0x2ed   : > { %v401_v57 = vpop.f32.mrf.mxu1 }
 0x2ee   : > { %v402_v58 = vadd.f32 %v401_v57, %v330_v56 }
 0x2ef   : > { %v597_v59 = vpop.f32.mrf.mxu1 }
 0x2f0   : > { %v405_v60 = vmax.f32 %v402_v58, 0.0 }
 0x2f2   : > { %v415_v61 = vmul.f32 %v405_v60, %v405_v60  ;;  %v407_v62 = vsel %vm406_vm3, %v405_v60, 0.0 }
 0x2f3   : > { %v408_v63 = vrot.slane %v407_v62, 4 }
 0x2f4   : > { %v416_v0 = vsel %vm406_vm3, %v415_v61, 0.0 }
 0x2f5   : > { %v409_v1 = vadd.f32 %v408_v63, %v407_v62  ;;  %v417_v2 = vrot.slane %v416_v0, 4 }
 0x2f7   : > { %v410_v3 = vrot.slane %v409_v1, 2  ;;  %v418_v4 = vadd.f32 %v417_v2, %v416_v0 }
 0x2f9   : > { %v411_v5 = vadd.f32 %v410_v3, %v409_v1  ;;  %v419_v6 = vrot.slane %v418_v4, 2 }
 0x2fb   : > { %v412_v7 = vrot.slane %v411_v5, 1  ;;  %v420_v8 = vadd.f32 %v419_v6, %v418_v4 }
 0x2fd   : > { %v413_v9 = vadd.f32 %v412_v7, %v411_v5  ;;  %v421_v10 = vrot.slane %v420_v8, 1 }
 0x2ff   : > { %v414_v11 = vmul.f32 0.125, %v413_v9  ;;  %v422_v12 = vadd.f32 %v421_v10, %v420_v8 }
 0x301   : > { %v423_v14 = vmul.f32 0.125, %v422_v12  ;;  %v424_v15 = vmul.f32 %v414_v11, %v414_v11 }
 0x303   : > { %v425_v16 = vsub.f32 %v423_v14, %v424_v15 }
 0x305   : > { %v426_v17 = vmax.f32 %v425_v16, 0.0 }
 0x307   : > { %v427_v18 = vadd.f32 1e-05, %v426_v17 }
 0x309   : > { %659 = vrsqrt.f32 %v427_v18 }
 0x316   : > { %v660_v20 = vpop.eup %659 }
 0x317   : > { %v432_v22 = vmul.f32 %v660_v20, %v430_v19 }
 0x319   : > { %v433_v23 = vmul.f32 %v432_v22, %v414_v11  ;;  %v439_v24 = vmul.f32 %v437_v21, %v432_v22 }
 0x31b   : > { %v434_v25 = vsub.f32 %v184_v53, %v433_v23  ;;  %v449_v26 = vrot.slane %v439_v24, %v902_v13 }
 0x31d   : > { %v440_v27 = vmul.f32 %v437_v21, %v434_v25  ;;  %v450_v28 = vmul.f32 %v449_v26, %v405_v60 }
 0x31f   : > { %v451_v29 = vsel %vm406_vm3, %v450_v28, 0.0  ;;  %v442_v30 = vsel %vm441_vm4, %v440_v27, 0.0 }
 0x320   : > { %452 = vadd.xlane.f32.xlu1 %v451_v29  ;;  %443 = vadd.xlane.f32.xlu0 %v442_v30 }
 0x3a9   : > { %v444_v31 = vpop.xlane.xlu0 %443  ;;  %v453_v34 = vpop.xlane.xlu1 %452 }
 0x3aa   : > { %v445_v32 = vadd.f32 %v444_v31, %v184_v53 }
 0x3ac   : > { %v457_v33 = vrot.slane %v445_v32, %v902_v13 }
 0x3ae   : > { %v458_v35 = vadd.f32 %v457_v33, %v453_v34 }
 0x3b0   : > { %460 = vrot.lane.b32.xlu0 %v458_v35, %s761_s14 }
 0x422   : > { %v461_v36 = vpop.permute.xlu0 %460 }
 0x423   : > { %464 = vst.msk [vmem:[%s173_s9] sm:$0xff] %vm463_vm5, %v461_v36 }
 0x424 PF: > { %p13_p7 = scmp.ge.s32.totalorder %s825_s19, 6   ;;  %s956_s9 = smov %s745_s10 }
 0x425   : > { %s957_s10 = smov %s749_s11  ;;  %s958_s11 = smov %s842_s27 }
 0x426   : > { %s959_s12 = smov %s825_s19  ;;  %15 = sbr.rel (!%p13_p7) target bundleno = 4 (0x4), region = 72 }
 0x42b   :  { %484 = vsyncpa [#allocation3], 1 }
 0x42c   :  { %486 = vsyncpa [#allocation3 + $0x1], 1 }
 0x42d   :  { %487 = vsyncpa [#allocation5], 1 }

</bundles_post_ra>
